<compile_context>
chip_gen: v7x
topology: tpu7x:2x2x1
jax: 0.10.0
libtpu: 0.0.40
codegen_flags: <defaults>
</compile_context>

<pallas_src>
import functools
import math

import jax
import jax.numpy as jnp
from jax import lax
from jax.experimental import pallas as pl
from jax.experimental.pallas import tpu as pltpu


def _round_up(x, m):
    return -(-x // m) * m


def _is_pow2(v):
    v = float(v)
    if v <= 0.0:
        return False
    return math.frexp(v)[0] == 0.5


def _vmem_capacity_bytes():
    """Per-TensorCore VMEM capacity; conservative (v7x, 64 MiB) fallback."""
    try:
        cap = getattr(pltpu.get_tpu_info(), "vmem_capacity_bytes", None)
        if cap:
            return int(cap)
    except Exception:
        pass
    return 64 * 1024 * 1024


def _qconv_kernel(a_ref, w_ref, b_ref, o_ref, *, has_bias, sb, inv_sb,
                  use_recip, min_q, max_q):
    """One (tm, Coutp) output tile of the im2col GEMM.

    Grid = (M tiles, K panels).  The quantized weight panel is weight-
    stationary (constant block index when K fits one panel => single DMA for
    the whole grid).  The f32 output tile is the accumulator itself: its block
    index is constant across the K axis, so it stays resident in VMEM and no
    scratch / epilogue copy is needed.  Output quantization + (pre-quantized)
    bias add run in place on the last K panel.  All scales / clip bounds are
    baked in as Python constants.
    """
    k = pl.program_id(1)

    @pl.when(k == 0)
    def _init():
        o_ref[...] = jnp.zeros_like(o_ref)

    # bf16 x bf16 -> f32 accumulate on the MXU, directly into the output tile.
    o_ref[...] += jnp.dot(a_ref[...], w_ref[...],
                          preferred_element_type=jnp.float32)

    if has_bias:
        @pl.when(k == pl.num_programs(1) - 1)
        def _finalize():
            acc = o_ref[...]
            # scale_b * clip(trunc(out / scale_b), -2**bit_b, 2**bit_b-1) + Qb
            scaled = acc * inv_sb if use_recip else acc / sb
            q = jnp.clip(jnp.trunc(scaled), min_q, max_q)
            o_ref[...] = sb * q + b_ref[...]


def _out_spatial(H, W, kh, kw, stride, padding, dilation):
    sh, sw = stride
    ph, pw = padding
    dh, dw = dilation
    Ho = (H + 2 * ph - dh * (kh - 1) - 1) // sh + 1
    Wo = (W + 2 * pw - dw * (kw - 1) - 1) // sw + 1
    return Ho, Wo


def _im2col_nhwc(x_nhwc, kh, kw, stride, padding, dilation):
    """(N,H,W,C) -> (N*Ho*Wo, kh*kw*C) patch matrix (plain-JAX glue).

    NHWC-first (per review): the taps come out channels-last / lane-dense
    directly, so no transpose over the kh*kw-expanded tensor is needed.
    K ordering is (i, j, c); the weight matrix is reordered to match.
    """
    N, H, W, C = x_nhwc.shape
    sh, sw = stride
    ph, pw = padding
    dh, dw = dilation
    Ho, Wo = _out_spatial(H, W, kh, kw, stride, padding, dilation)
    if (kh, kw) == (1, 1) and stride == (1, 1) and padding == (0, 0):
        return x_nhwc.reshape(N * Ho * Wo, C), Ho, Wo
    xp = jnp.pad(x_nhwc, ((0, 0), (ph, ph), (pw, pw), (0, 0)))
    taps = []
    for i in range(kh):
        for j in range(kw):
            h0, w0 = i * dh, j * dw
            taps.append(lax.slice(
                xp,
                (0, h0, w0, 0),
                (N, h0 + sh * (Ho - 1) + 1, w0 + sw * (Wo - 1) + 1, C),
                (1, sh, sw, 1)))                       # (N, Ho, Wo, C)
    A = jnp.concatenate(taps, axis=-1)                 # (N, Ho, Wo, kh*kw*C)
    return A.reshape(N * Ho * Wo, kh * kw * C), Ho, Wo


class QConv2dPallas:
    """Pallas-TPU equivalent of Q_conv2d (forward only, groups=1)."""

    def __init__(self, in_channels, out_channels, kernel_size, stride=(1, 1),
                 padding=(0, 0), dilation=(1, 1), groups=1, bias=True,
                 bit_w=8, bit_b=8, scale_w=2 ** (-5), scale_b=2 ** (-5),
                 key=None):
        if groups != 1:
            # TODO(synk): grouped conv (groups > 1) not implemented.
            raise NotImplementedError("groups > 1 not implemented")
        self.in_channels = in_channels
        self.out_channels = out_channels
        self.kernel_size = tuple(kernel_size)
        self.stride = tuple(stride)
        self.padding = tuple(padding)
        self.dilation = tuple(dilation)
        self.bit_w = int(bit_w)
        self.bit_b = int(bit_b)
        self.scale_w = jnp.array([scale_w], dtype=jnp.float32)
        self.scale_b = jnp.array([scale_b], dtype=jnp.float32)
        self._scale_w_f = float(scale_w)
        self._scale_b_f = float(scale_b)

        # bf16 operands are bit-exact for the quantized weights only when the
        # scale is a power of two and bit_w <= 8 (ints in [-2**bit_w, 2**bit_w)
        # times a power-of-two scale are exact in bf16); otherwise fall back
        # to f32 operands.  The activation bf16 cast can still move a trunc
        # boundary by at most one quantization step (documented tolerance).
        self._exact_bf16_w = (self.bit_w <= 8) and _is_pow2(self._scale_w_f)
        self._compute_dtype = jnp.bfloat16 if self._exact_bf16_w else jnp.float32

        # deterministic init mirroring Q_conv2d.init(): uniform(-stdv, stdv)
        n = in_channels
        for k in self.kernel_size:
            n *= k
        stdv = 1.0 / math.sqrt(n)
        if key is None:
            key = jax.random.PRNGKey(0)
        kw_key, kb_key = jax.random.split(key)
        self.weight = jax.random.uniform(
            kw_key, (out_channels, in_channels, *self.kernel_size),
            dtype=jnp.float32, minval=-stdv, maxval=stdv)
        if bias:
            self.bias = jax.random.uniform(
                kb_key, (out_channels,), dtype=jnp.float32,
                minval=-stdv, maxval=stdv)
        else:
            self.bias = None

        # jit the wrapper so XLA fuses the im2col glue (pad/slice/concat).
        self._forward = jax.jit(self._forward_impl,
                                static_argnames=("channels_last_output",))

    def __call__(self, x, channels_last_output=False):
        return self._forward(x, channels_last_output=channels_last_output)

    def _forward_impl(self, x, channels_last_output=False):
        kh, kw = self.kernel_size
        N = x.shape[0]
        Cin = self.in_channels
        Cout = self.out_channels
        K = Cin * kh * kw
        dt = self._compute_dtype
        op_bytes = 2 if dt == jnp.bfloat16 else 4

        # ---- weight / bias quantization, hoisted out of the kernel --------
        sw = self._scale_w_f
        qw = sw * jnp.clip(jnp.trunc(self.weight / sw),
                           -(2.0 ** self.bit_w), 2.0 ** self.bit_w - 1.0)
        # reorder (Cout,Cin,kh,kw) -> (kh,kw,Cin,Cout) to match the (i, j, c)
        # K ordering of the NHWC im2col patches.
        Wmat = qw.transpose(2, 3, 1, 0).reshape(K, Cout).astype(dt)

        sb = self._scale_b_f
        if self.bias is not None:
            qb = sb * jnp.clip(jnp.trunc(self.bias / sb),
                               -(2.0 ** self.bit_b), 2.0 ** self.bit_b - 1.0)
        else:
            qb = jnp.zeros((Cout,), dtype=jnp.float32)

        # ---- im2col glue (NHWC-first, channels-last / lane-dense) ---------
        # TODO(synk): fully fuse im2col into the kernel (manual DMA of shifted
        # NHWC windows per K panel) to avoid materializing the patch matrix.
        x_nhwc = x.astype(dt).transpose(0, 2, 3, 1)
        A, Ho, Wo = _im2col_nhwc(x_nhwc, kh, kw, self.stride, self.padding,
                                 self.dilation)
        M = A.shape[0]

        # ---- tiling: weight-stationary, lane-dense Cout, VMEM-sized tm ----
        vmem_cap = _vmem_capacity_bytes()
        # <= ~54 MiB on v7x (64 MiB/TC); up to ~100 MiB on v5e/v6e (128 MiB).
        vmem_budget = min(int(vmem_cap * 0.85), 100 * 1024 * 1024)

        # lane-dense Cout; 256-aligned for the 256x256 MXUs (v6e/v7x) once it
        # exceeds a single 128-lane tile.
        Coutp = 128 if Cout <= 128 else _round_up(Cout, 256)

        # W panel: full-K resident when it fits half the budget (one DMA for
        # the whole grid); otherwise ~2048-wide K panels on the reduction axis.
        if 2 * K * Coutp * op_bytes <= vmem_budget // 2:
            tk, Kp = K, K
        else:
            tk = 2048
            while tk > 256 and 2 * tk * Coutp * op_bytes > vmem_budget // 2:
                tk //= 2
            Kp = _round_up(K, tk)

        # M tile: as large as VMEM allows (<=1024), >=2 blocks so both v7x
        # TensorCores get work, preferring a tile that divides M so the final
        # unpad slice is a no-op.
        M8 = _round_up(M, 8)
        fixed = 2 * tk * Coutp * op_bytes + 2 * Coutp * 4
        per_row = 2 * tk * op_bytes + 2 * Coutp * 4
        tm_cap = max(8, (max(vmem_budget - fixed, per_row) // per_row) // 8 * 8)
        target = min(1024, tm_cap, M8)
        if M8 >= 16:
            target = min(target, _round_up((M8 + 1) // 2, 8))
        target = max(8, (target // 8) * 8)
        tm = None
        t = target
        while t >= max(8, target - 256):
            if M8 % t == 0:
                tm = t
                break
            t -= 8
        if tm is None:                      # no clean divisor: balance blocks
            nblk = -(-M8 // target)
            tm = _round_up(-(-M8 // nblk), 8)
        Mp = _round_up(M8, tm)

        if (Mp, Kp) != (M, K):
            A = jnp.pad(A, ((0, Mp - M), (0, Kp - K)))
        if (Kp, Coutp) != (K, Cout):
            Wmat = jnp.pad(Wmat, ((0, Kp - K), (0, Coutp - Cout)))
        b2d = jnp.pad(qb.astype(jnp.float32).reshape(1, Cout),
                      ((0, 0), (0, Coutp - Cout)))

        m_blocks, k_blocks = Mp // tm, Kp // tk
        grid = (m_blocks, k_blocks)

        footprint = (2 * tm * tk * op_bytes       # A tile (double-buffered)
                     + 2 * tk * Coutp * op_bytes  # W panel (worst-case x2)
                     + 2 * tm * Coutp * 4         # f32 output/accumulator tile
                     + 2 * Coutp * 4)             # bias row
        vmem_limit = int(min(vmem_budget, max(footprint + (4 << 20), 16 << 20)))

        kernel = functools.partial(
            _qconv_kernel,
            has_bias=self.bias is not None,
            sb=sb, inv_sb=1.0 / sb, use_recip=_is_pow2(sb),
            min_q=-(2.0 ** self.bit_b), max_q=2.0 ** self.bit_b - 1.0)

        # W is re-read per M tile only when K is panelled; A read exactly once.
        w_reads = 1 if k_blocks == 1 else m_blocks

        out = pl.pallas_call(
            kernel,
            out_shape=jax.ShapeDtypeStruct((Mp, Coutp), jnp.float32),
            grid=grid,
            in_specs=[
                pl.BlockSpec((tm, tk), lambda i, k: (i, k)),      # im2col A
                pl.BlockSpec((tk, Coutp), lambda i, k: (k, 0)),   # stationary W
                pl.BlockSpec((1, Coutp), lambda i, k: (0, 0)),    # quantized b
            ],
            out_specs=pl.BlockSpec((tm, Coutp), lambda i, k: (i, 0)),
            compiler_params=pltpu.CompilerParams(
                dimension_semantics=("parallel", "arbitrary"),
                vmem_limit_bytes=vmem_limit),
            cost_estimate=pl.CostEstimate(
                flops=int(2 * Mp * Kp * Coutp),
                transcendentals=0,
                bytes_accessed=int(Mp * Kp * op_bytes
                                   + w_reads * Kp * Coutp * op_bytes
                                   + Mp * Coutp * 4 + Coutp * 4)),
        )(A, Wmat, b2d)

        out = out[:M, :Cout].reshape(N, Ho, Wo, Cout)
        if channels_last_output:
            return out   # NHWC: skips a full HBM round-trip of the output
        # TODO(synk): emit (Coutp, Mp) from the kernel (per-tile XLU transpose)
        # so the NCHW permute only touches leading axes.
        return out.transpose(0, 3, 1, 2)


def _reference(x, mod):
    """Pure-JAX reference of Q_conv2d.forward (for validation)."""
    def quant(v, s, bit):
        return s * jnp.clip(jnp.trunc(v / s), -(2.0 ** bit), 2.0 ** bit - 1.0)

    sw = mod.scale_w[0]
    sb = mod.scale_b[0]
    qw = quant(mod.weight, sw, mod.bit_w)
    ph, pw = mod.padding
    out = lax.conv_general_dilated(
        x, qw, window_strides=mod.stride,
        padding=[(ph, ph), (pw, pw)],
        rhs_dilation=mod.dilation,
        dimension_numbers=("NCHW", "OIHW", "NCHW"))
    if mod.bias is not None:
        qb = quant(mod.bias, sb, mod.bit_b)
        out = quant(out, sb, mod.bit_b) + qb[None, :, None, None]
    return out


if __name__ == "__main__":
    key = jax.random.PRNGKey(0)
    k_x, k_mod = jax.random.split(key)

    # small shapes consistent with the module
    N, Cin, H, W = 2, 4, 16, 16
    Cout, ksize = 8, (3, 3)

    mod = QConv2dPallas(Cin, Cout, ksize, stride=(1, 1), padding=(1, 1),
                        dilation=(1, 1), groups=1, bias=True, key=k_mod)
    x = jax.random.normal(k_x, (N, Cin, H, W), dtype=jnp.float32)

    y = jax.block_until_ready(mod(x))
    y_ref = jax.block_until_ready(_reference(x, mod))

    assert y.shape == (N, Cout, H, W), y.shape
    # bf16 activation operands can move a trunc boundary by at most one
    # quantization step (difference is 0 or exactly scale_b).
    max_err = float(jnp.max(jnp.abs(y - y_ref)))
    assert max_err <= float(mod.scale_b[0]) + 1e-5, max_err

    print("KERNEL_OK")
</pallas_src>

<mosaic_0001>
module attributes {stable_mosaic.version = 11 : i64} {
  func.func @_qconv_kernel(%arg0: i32, %arg1: i32, %arg2: memref<256x36xbf16, #tpu.memory_space<vmem>>, %arg3: memref<36x128xbf16, #tpu.memory_space<vmem>>, %arg4: memref<1x128xf32, #tpu.memory_space<vmem>>, %arg5: memref<256x128xf32, #tpu.memory_space<vmem>>) attributes {dimension_semantics = [#tpu.dimension_semantics<parallel>, #tpu.dimension_semantics<arbitrary>], iteration_bounds = array<i64: 2, 1>, scalar_prefetch = 0 : i64, scratch_operands = 0 : i64, tpu.core_type = #tpu.core_type<tc>, window_params = [{transform_indices = @transform_0, window_bounds = array<i64: 256, 36>}, {transform_indices = @transform_1, window_bounds = array<i64: 36, 128>}, {pipeline_mode = #tpu.pipeline_mode<synchronous>, transform_indices = @transform_2, window_bounds = array<i64: 1, 128>}, {transform_indices = @transform_3, window_bounds = array<i64: 256, 128>}]} {
    %c0_i32 = arith.constant 0 : i32
    %0 = arith.cmpi eq, %arg1, %c0_i32 : i32
    %1 = arith.extui %0 : i1 to i32
    %c0_i32_0 = arith.constant 0 : i32
    %2 = arith.cmpi ne, %1, %c0_i32_0 : i32
    scf.if %2 {
      %cst_10 = arith.constant 0.000000e+00 : f32
      %12 = vector.broadcast %cst_10 : f32 to vector<256x128xf32>
      %c0_11 = arith.constant 0 : index
      %c0_12 = arith.constant 0 : index
      %13 = vector.load %arg5[%c0_11, %c0_12] : memref<256x128xf32, #tpu.memory_space<vmem>>, vector<256x128xf32>
      tpu.vector_store %arg5[%c0_11, %c0_12], %12 {strides = array<i32>} : memref<256x128xf32, #tpu.memory_space<vmem>>, vector<256x128xf32>,
    } else {
    }
    %c0 = arith.constant 0 : index
    %c0_1 = arith.constant 0 : index
    %3 = vector.load %arg5[%c0, %c0_1] : memref<256x128xf32, #tpu.memory_space<vmem>>, vector<256x128xf32>
    %c0_2 = arith.constant 0 : index
    %c0_3 = arith.constant 0 : index
    %4 = vector.load %arg2[%c0_2, %c0_3] : memref<256x36xbf16, #tpu.memory_space<vmem>>, vector<256x36xbf16>
    %c0_4 = arith.constant 0 : index
    %c0_5 = arith.constant 0 : index
    %5 = vector.load %arg3[%c0_4, %c0_5] : memref<36x128xbf16, #tpu.memory_space<vmem>>, vector<36x128xbf16>
    %cst = arith.constant dense<0.000000e+00> : vector<256x128xf32>
    %6 = tpu.matmul %4, %5, %cst {dimension_numbers = #tpu.dot_dimension_numbers<[1], [0], [0], [1], [0, 0, 1, 1], [], []>} : vector<256x36xbf16>, vector<36x128xbf16>, vector<256x128xf32> -> vector<256x128xf32>
    %7 = arith.addf %3, %6 : vector<256x128xf32>
    %c0_6 = arith.constant 0 : index
    %c0_7 = arith.constant 0 : index
    %8 = vector.load %arg5[%c0_6, %c0_7] : memref<256x128xf32, #tpu.memory_space<vmem>>, vector<256x128xf32>
    tpu.vector_store %arg5[%c0_6, %c0_7], %7 {strides = array<i32>} : memref<256x128xf32, #tpu.memory_space<vmem>>, vector<256x128xf32>,
    %c0_i32_8 = arith.constant 0 : i32
    %9 = arith.cmpi eq, %arg1, %c0_i32_8 : i32
    %10 = arith.extui %9 : i1 to i32
    %c0_i32_9 = arith.constant 0 : i32
    %11 = arith.cmpi ne, %10, %c0_i32_9 : i32
    scf.if %11 {
      %c0_10 = arith.constant 0 : index
      %c0_11 = arith.constant 0 : index
      %12 = vector.load %arg5[%c0_10, %c0_11] : memref<256x128xf32, #tpu.memory_space<vmem>>, vector<256x128xf32>
      %cst_12 = arith.constant 3.200000e+01 : f32
      %13 = vector.broadcast %cst_12 : f32 to vector<256x128xf32>
      %14 = arith.mulf %12, %13 : vector<256x128xf32>
      %cst_13 = arith.constant 0.000000e+00 : f32
      %15 = vector.broadcast %cst_13 : f32 to vector<256x128xf32>
      %16 = arith.cmpf olt, %14, %15 : vector<256x128xf32>
      %17 = math.ceil %14 : vector<256x128xf32>
      %18 = math.floor %14 : vector<256x128xf32>
      %19 = arith.select %16, %17, %18 : vector<256x128xi1>, vector<256x128xf32>
      %cst_14 = arith.constant -2.560000e+02 : f32
      %cst_15 = arith.constant 2.550000e+02 : f32
      %20 = vector.broadcast %cst_14 : f32 to vector<256x128xf32>
      %21 = arith.maximumf %20, %19 : vector<256x128xf32>
      %22 = vector.broadcast %cst_15 : f32 to vector<256x128xf32>
      %23 = arith.minimumf %22, %21 : vector<256x128xf32>
      %cst_16 = arith.constant 3.125000e-02 : f32
      %24 = vector.broadcast %cst_16 : f32 to vector<256x128xf32>
      %25 = arith.mulf %24, %23 : vector<256x128xf32>
      %c0_17 = arith.constant 0 : index
      %c0_18 = arith.constant 0 : index
      %26 = vector.load %arg4[%c0_17, %c0_18] : memref<1x128xf32, #tpu.memory_space<vmem>>, vector<1x128xf32>
      %27 = vector.broadcast %26 : vector<1x128xf32> to vector<256x128xf32>
      %28 = arith.addf %25, %27 : vector<256x128xf32>
      %c0_19 = arith.constant 0 : index
      %c0_20 = arith.constant 0 : index
      %29 = vector.load %arg5[%c0_19, %c0_20] : memref<256x128xf32, #tpu.memory_space<vmem>>, vector<256x128xf32>
      tpu.vector_store %arg5[%c0_19, %c0_20], %28 {strides = array<i32>} : memref<256x128xf32, #tpu.memory_space<vmem>>, vector<256x128xf32>,
    } else {
    }
    return
  }
  func.func @transform_0(%arg0: i32, %arg1: i32) -> (i32, i32) {
    %c0_i32 = arith.constant 0 : i32
    return %arg0, %arg1 : i32, i32
  }
  func.func @transform_1(%arg0: i32, %arg1: i32) -> (i32, i32) {
    %c0_i32 = arith.constant 0 : i32
    %c0_i32_0 = arith.constant 0 : i32
    return %arg1, %c0_i32 : i32, i32
  }
  func.func @transform_2(%arg0: i32, %arg1: i32) -> (i32, i32) {
    %c0_i32 = arith.constant 0 : i32
    %c0_i32_0 = arith.constant 0 : i32
    %c0_i32_1 = arith.constant 0 : i32
    return %c0_i32, %c0_i32_0 : i32, i32
  }
  func.func @transform_3(%arg0: i32, %arg1: i32) -> (i32, i32) {
    %c0_i32 = arith.constant 0 : i32
    %c0_i32_0 = arith.constant 0 : i32
    return %arg0, %c0_i32 : i32, i32
  }
}

</mosaic_0001>

<bundles_post_ra>
// kernel: _forward_impl.1
= control target key start
LH: loop header
LB: loop body
LE: loop exit
PB: predicated region body
PF: predicated region fallthrough
CT: control target
= control target key end

     0   :  { %s1344_s12 = smov 0   ;;  %s1346_s13 = smov 0   ;;  %s1575_s0 = inlined_call_operand.vmem [shape: bf16[512,36], index: 0, kind: input, shape index: {}]   ;;  %s1576_s1 = inlined_call_operand.vmem [shape: bf16[36,128], index: 1, kind: input, shape index: {}]   ;;  %s1577_s2 = inlined_call_operand.vmem [shape: f32[1,128], index: 2, kind: input, shape index: {}]   ;;  %s1578_s3 = inlined_call_operand.vmem [shape: f32[512,128], index: 3, kind: output, shape index: {}]  }
   0x1   :  { %s1348_s14 = smov 0  }
   0x2 LB: > { %s25_s15 = sadd.s32 1, %s1318_s13  ;;  %p1148_p0 = scmp.ge.s32.totalorder %s1322_s14, 1  ;;  %s1322_s14 = sphi %s1348_s14, %s13_s14   ;;  %s1318_s13 = sphi %s1346_s13, %s1580_s13   ;;  %s1314_s12 = sphi %s1344_s12, %s1579_s12  }
   0x3   : > { %p27_p1 = scmp.ge.s32.totalorder %s25_s15, 2  ;;  %p166_p2 = scmp.lt.s32.totalorder %s1322_s14, 3 }
   0x5   : > { %s1582_s15 = smov (%p27_p1, %s25_s15), 0  ;;  %p167_p3 = pnand %p1148_p0, %p166_p2 }
   0x6   : > { %v1281_v0 = vld [vmem:[%s1576_s1] sm:$0xff] (!%p167_p3)   ;;  %v1282_v1 = vld [vmem:[%s1576_s1 + $0x8] sm:$0xff] (!%p167_p3)   ;;  %s1149_s20 = sshll.u32 (!%p167_p3), %s1314_s12, 5  ;;  %v1283_v2 = vld [vmem:[%s1576_s1 + $0x10] ss:$0 sps:$4 sm:$0x33] (!%p167_p3)  }
   0x7   : > { %170 = sbr.rel (%p167_p3) target bundleno = 312 (0x138), region = 32  ;;  %1210 = vmatprep.subr.bf16.mxu0 (!%p167_p3), %v1281_v0  ;;  %1248 = vmatprep.subr.bf16.mxu1 (!%p167_p3), %v1281_v0  ;;  %p199_p4 = scmp.lt.s32.totalorder (!%p167_p3), %s1149_s20, 63  ;;  %vm469_vm0 = vcmask (!%p167_p3), 1041408   ;;  %vm420_vm1 = vcmask (!%p167_p3), 293888   ;;  %v1430_v57 = vld [vmem:[%s1577_s2] ss:$0 sm:$0xff] (!%p167_p3) }
   0x8   : > { %1211 = vmatpush3.bf16.msra.mxu0 (!%p167_p3), %v1281_v0  ;;  %1251 = vmatpush3.bf16.msra.mxu1 (!%p167_p3), %v1281_v0  ;;  %v471_v3 = vsel (!%p167_p3), %vm469_vm0, %v1283_v2, 0 }
   0x9   : > { %1212 = vmatprep.subr.bf16.mxu0 (!%p167_p3), %v1282_v1  ;;  %1249 = vmatprep.subr.bf16.mxu1 (!%p167_p3), %v1282_v1 }
   0xc   : > { %1213 = vmatpush3.bf16.msra.mxu0 (!%p167_p3), %v1282_v1  ;;  %1252 = vmatpush3.bf16.msra.mxu1 (!%p167_p3), %v1282_v1 }
   0xd   : > { %1254 = vmatprep.subr.msk.bf16.mxu0 (!%p167_p3), %vm469_vm0, %v1283_v2  ;;  %1255 = vmatprep.subr.msk.bf16.mxu1 (!%p167_p3), %vm469_vm0, %v1283_v2 }
   0xe   : > { %s1584_s20 = smov (!%p199_p4, %s1149_s20), 63 }
   0xf   : > { %s1150_s23 = sshll.u32 %s1584_s20, 2  ;;  %s1152_s27 = sshll.u32 %s1584_s20, 3 }
  0x10   : > { %s1377_s26 = scalar_lea.vmem %s1575_s0, %s1150_s23  ;;  %1215 = vmatpush3.bf16.msra.mxu0 %v471_v3  ;;  %1253 = vmatpush3.bf16.msra.mxu1 %v471_v3  ;;  %s1439_s5 = scalar_lea.vmem %s1578_s3, %s1152_s27 }
  0x11   : > { %v1284_v4 = vld [vmem:[%s1377_s26] sm:$0xff]   ;;  %v1286_v6 = vld [vmem:[%s1377_s26 + $0x8] sm:$0xff]   ;;  %v1288_v8 = vld [vmem:[%s1377_s26 + $0x10] sm:$0xff]  }
  0x12   : > { %v1285_v5 = vld [vmem:[%s1377_s26 + $0x40] sm:$0xff]   ;;  %1216 = vmatprep.mubr.msk.bf16.mxu0 %vm420_vm1, %v1284_v4  ;;  %v1287_v7 = vld [vmem:[%s1377_s26 + $0x48] sm:$0xff]   ;;  %v1289_v9 = vld [vmem:[%s1377_s26 + $0x50] sm:$0xff]  }
  0x13   : > { %1232 = vmatprep.mubr.msk.bf16.mxu1 %vm420_vm1, %v1285_v5  ;;  %1217 = vmatmul.mubr.msk.bf16.vlgmr.msra.gmra.mrb[0].mxu0 %vm420_vm1, %v1286_v6  ;;  %v1290_v10 = vld [vmem:[%s1377_s26 + $0x18] sm:$0xff]   ;;  %v1292_v12 = vld [vmem:[%s1377_s26 + $0x20] sm:$0xff]   ;;  %v1294_v14 = vld [vmem:[%s1377_s26 + $0x28] sm:$0xff]  }
  0x14   : > { %1233 = vmatmul.mubr.msk.bf16.vlgmr.msra.gmra.mrb[0].mxu1 %vm420_vm1, %v1287_v7  ;;  %1220 = vmatprep.mubr.msk.bf16.mxu0 %vm420_vm1, %v1288_v8  ;;  %v1291_v11 = vld [vmem:[%s1377_s26 + $0x58] sm:$0xff]   ;;  %v1293_v13 = vld [vmem:[%s1377_s26 + $0x60] sm:$0xff]   ;;  %v1295_v15 = vld [vmem:[%s1377_s26 + $0x68] sm:$0xff]  }
  0x15   : > { %1236 = vmatprep.mubr.msk.bf16.mxu1 %vm420_vm1, %v1289_v9  ;;  %v1296_v16 = vld [vmem:[%s1377_s26 + $0x30] sm:$0xff]   ;;  %v1298_v18 = vld [vmem:[%s1377_s26 + $0x38] sm:$0xff]  }
  0x16   : > { %v1297_v17 = vld [vmem:[%s1377_s26 + $0x70] sm:$0xff]   ;;  %v1299_v19 = vld [vmem:[%s1377_s26 + $0x78] sm:$0xff]  }
  0x1b   : > { %1221 = vmatmul.mubr.msk.bf16.gmra.mrb[4].mxu0 %vm420_vm1, %v1290_v10 }
  0x1c   : > { %1237 = vmatmul.mubr.msk.bf16.gmra.mrb[4].mxu1 %vm420_vm1, %v1291_v11  ;;  %1224 = vmatprep.mubr.msk.bf16.mxu0 %vm420_vm1, %v1292_v12 }
  0x1d   : > { %1240 = vmatprep.mubr.msk.bf16.mxu1 %vm420_vm1, %v1293_v13 }
  0x23   : > { %1225 = vmatmul.mubr.msk.bf16.gmra.mrb[8].mxu0 %vm420_vm1, %v1294_v14 }
  0x24   : > { %1241 = vmatmul.mubr.msk.bf16.gmra.mrb[8].mxu1 %vm420_vm1, %v1295_v15  ;;  %1228 = vmatprep.mubr.msk.bf16.mxu0 %vm420_vm1, %v1296_v16 }
  0x25   : > { %1244 = vmatprep.mubr.msk.bf16.mxu1 %vm420_vm1, %v1297_v17 }
  0x2b   : > { %1229 = vmatmul.mubr.msk.bf16.gmra.mrb[12].mxu0 %vm420_vm1, %v1298_v18 }
  0x2c   : > { %1245 = vmatmul.mubr.msk.bf16.gmra.mrb[12].mxu1 %vm420_vm1, %v1299_v19 }
  0xe6   : > { %v1218_v20 = vpop.f32.mrb[0].mxu0 }
  0xe7   : > { %v1234_v21 = vpop.f32.mrb[0].mxu1  ;;  %v507_v22 = vpop.f32.mrb[1].mxu0  ;;  %v735_v26 = vmul.f32 32.0, %v1218_v20 }
  0xe8   : > { %v571_v23 = vpop.f32.mrb[1].mxu1  ;;  %v1219_v24 = vpop.f32.mrb[2].mxu0  ;;  %v751_v27 = vmul.f32 32.0, %v1234_v21  ;;  %v733_v30 = vmul.f32 32.0, %v507_v22 }
  0xe9   : > { %v1235_v25 = vpop.f32.mrb[2].mxu1  ;;  %v510_v28 = vpop.f32.mrb[3].mxu0  ;;  %v749_v31 = vmul.f32 32.0, %v571_v23  ;;  %vm767_vm2 = vcmp.lt.f32.partialorder %v735_v26, 0.0  ;;  %v799_v32 = vceil.f32 %v735_v26  ;;  %v831_v33 = vfloor.f32 %v735_v26 }
  0xea   : > { %v1411_v29 = vpop.f32.mrb[3].mxu1  ;;  %vm783_vm3 = vcmp.lt.f32.partialorder %v751_v27, 0.0  ;;  %v815_v34 = vceil.f32 %v751_v27  ;;  %v847_v35 = vfloor.f32 %v751_v27  ;;  %vm765_vm4 = vcmp.lt.f32.partialorder %v733_v30, 0.0 }
  0xeb   : > { %v797_v36 = vceil.f32 %v733_v30  ;;  %v863_v37 = vsel %vm767_vm2, %v799_v32, %v831_v33  ;;  %v829_v38 = vfloor.f32 %v733_v30  ;;  %vm781_vm5 = vcmp.lt.f32.partialorder %v749_v31, 0.0 }
  0xec   : > { %v813_v39 = vceil.f32 %v749_v31  ;;  %v895_v40 = vmax.f32 %v863_v37, -256.0  ;;  %v879_v41 = vsel %vm783_vm3, %v815_v34, %v847_v35  ;;  %v845_v42 = vfloor.f32 %v749_v31 }
  0xed   : > { %v736_v43 = vmul.f32 32.0, %v1219_v24  ;;  %v911_v46 = vmax.f32 %v879_v41, -256.0  ;;  %v861_v47 = vsel %vm765_vm4, %v797_v36, %v829_v38  ;;  %v752_v48 = vmul.f32 32.0, %v1235_v25 }
  0xee   : > { %v1413_v44 = vpop.f32.mrb[4].mxu0  ;;  %v734_v49 = vmul.f32 32.0, %v510_v28  ;;  %v927_v52 = vmin.f32 %v895_v40, 255.0  ;;  %v893_v53 = vmax.f32 %v861_v47, -256.0  ;;  %v877_v54 = vsel %vm781_vm5, %v813_v39, %v845_v42 }
  0xef   : > { %v1415_v45 = vpop.f32.mrb[4].mxu1  ;;  %v1417_v50 = vpop.f32.mrb[5].mxu0  ;;  %vm768_vm6 = vcmp.lt.f32.partialorder %v736_v43, 0.0  ;;  %v943_v58 = vmin.f32 %v911_v46, 255.0  ;;  %v909_v59 = vmax.f32 %v877_v54, -256.0  ;;  %v800_v60 = vceil.f32 %v736_v43 }
  0xf0   : > { %v1419_v51 = vpop.f32.mrb[5].mxu1  ;;  %v1423_v55 = vpop.f32.mrb[6].mxu0  ;;  %v832_v61 = vfloor.f32 %v736_v43  ;;  %v959_v0 = vmul.f32 0.03125, %v927_v52  ;;  %v925_v1 = vmin.f32 %v893_v53, 255.0  ;;  %vm784_vm7 = vcmp.lt.f32.partialorder %v752_v48, 0.0 }
  0xf1   : > { %v1425_v56 = vpop.f32.mrb[6].mxu1  ;;  %v1432_v62 = vpop.f32.mrb[7].mxu0  ;;  %v816_v2 = vceil.f32 %v752_v48  ;;  %v975_v3 = vmul.f32 0.03125, %v943_v58  ;;  %v941_v4 = vmin.f32 %v909_v59, 255.0  ;;  %v848_v6 = vfloor.f32 %v752_v48 }
  0xf2   : > { %v1434_v63 = vpop.f32.mrb[7].mxu1  ;;  %v864_v5 = vsel %vm768_vm6, %v800_v60, %v832_v61  ;;  %v998_v7 = vadd.f32 %v1430_v57, %v959_v0  ;;  %v957_v8 = vmul.f32 0.03125, %v925_v1  ;;  %vm766_vm8 = vcmp.lt.f32.partialorder %v734_v49, 0.0 }
  0xf3   : > { %v896_v9 = vmax.f32 %v864_v5, -256.0  ;;  %v1014_v10 = vadd.f32 %v1430_v57, %v975_v3  ;;  %v973_v11 = vmul.f32 0.03125, %v941_v4  ;;  %v880_v12 = vsel %vm784_vm7, %v816_v2, %v848_v6 }
  0xf4   : > { %v798_v13 = vceil.f32 %v734_v49  ;;  %1030 = vst [vmem:[%s1439_s5 + $0x10] sm:$0xff] %v998_v7  ;;  %v996_v14 = vadd.f32 %v1430_v57, %v957_v8  ;;  %v912_v16 = vmax.f32 %v880_v12, -256.0  ;;  %v830_v17 = vfloor.f32 %v734_v49 }
  0xf5   : > { %v928_v15 = vmin.f32 %v896_v9, 255.0  ;;  %1046 = vst [vmem:[%s1439_s5 + $0x90] sm:$0xff] %v1014_v10  ;;  %v1012_v20 = vadd.f32 %v1430_v57, %v973_v11  ;;  %v750_v21 = vmul.f32 32.0, %v1411_v29  ;;  %v739_v36 = vmul.f32 32.0, %v1413_v44 }
  0xf6   : > { %v1446_v18 = vpop.f32.mrb[8].mxu0  ;;  %1028 = vst [vmem:[%s1439_s5] sm:$0xff] %v996_v14  ;;  %v944_v25 = vmin.f32 %v912_v16, 255.0  ;;  %v862_v26 = vsel %vm766_vm8, %v798_v13, %v830_v17  ;;  %v755_v37 = vmul.f32 32.0, %v1415_v45  ;;  %v737_v40 = vmul.f32 32.0, %v1417_v50 }
  0xf7   : > { %v1448_v19 = vpop.f32.mrb[8].mxu1  ;;  %v1453_v22 = vpop.f32.mrb[9].mxu0  ;;  %v960_v24 = vmul.f32 0.03125, %v928_v15  ;;  %1044 = vst [vmem:[%s1439_s5 + $0x80] sm:$0xff] %v1012_v20  ;;  %v894_v30 = vmax.f32 %v862_v26, -256.0  ;;  %vm782_vm9 = vcmp.lt.f32.partialorder %v750_v21, 0.0  ;;  %v814_v31 = vceil.f32 %v750_v21 }
  0xf8   : > { %v1455_v23 = vpop.f32.mrb[9].mxu1  ;;  %v1459_v27 = vpop.f32.mrb[10].mxu0  ;;  %v846_v32 = vfloor.f32 %v750_v21  ;;  %v976_v35 = vmul.f32 0.03125, %v944_v25  ;;  %vm771_vm10 = vcmp.lt.f32.partialorder %v739_v36, 0.0  ;;  %v803_v43 = vceil.f32 %v739_v36 }
  0xf9   : > { %v1461_v28 = vpop.f32.mrb[10].mxu1  ;;  %v1464_v29 = vpop.f32.mrb[11].mxu0  ;;  %v999_v34 = vadd.f32 %v1430_v57, %v960_v24  ;;  %v926_v38 = vmin.f32 %v894_v30, 255.0  ;;  %v835_v47 = vfloor.f32 %v739_v36  ;;  %vm787_vm11 = vcmp.lt.f32.partialorder %v755_v37, 0.0 }
  0xfa   : > { %v1466_v33 = vpop.f32.mrb[11].mxu1  ;;  %v878_v39 = vsel %vm782_vm9, %v814_v31, %v846_v32  ;;  %v1015_v41 = vadd.f32 %v1430_v57, %v976_v35  ;;  %v819_v48 = vceil.f32 %v755_v37  ;;  %v851_v52 = vfloor.f32 %v755_v37 }
  0xfb   : > { %1031 = vst [vmem:[%s1439_s5 + $0x18] sm:$0xff] %v999_v34  ;;  %v910_v42 = vmax.f32 %v878_v39, -256.0  ;;  %v958_v46 = vmul.f32 0.03125, %v926_v38  ;;  %vm769_vm12 = vcmp.lt.f32.partialorder %v737_v40, 0.0  ;;  %v801_v44 = vceil.f32 %v737_v40 }
  0xfc   : > { %1047 = vst [vmem:[%s1439_s5 + $0x98] sm:$0xff] %v1015_v41  ;;  %v867_v54 = vsel %vm771_vm10, %v803_v43, %v835_v47  ;;  %v833_v58 = vfloor.f32 %v737_v40  ;;  %v753_v59 = vmul.f32 32.0, %v1419_v51  ;;  %v883_v2 = vsel %vm787_vm11, %v819_v48, %v851_v52 }
  0xfd   : > { %v942_v49 = vmin.f32 %v910_v42, 255.0  ;;  %v997_v50 = vadd.f32 %v1430_v57, %v958_v46  ;;  %v899_v1 = vmax.f32 %v867_v54, -256.0  ;;  %v915_v5 = vmax.f32 %v883_v2, -256.0 }
  0xfe   : > { %v1475_v45 = vpop.f32.mrb[12].mxu0  ;;  %v865_v6 = vsel %vm769_vm12, %v801_v44, %v833_v58  ;;  %vm785_vm13 = vcmp.lt.f32.partialorder %v753_v59, 0.0  ;;  %v817_v7 = vceil.f32 %v753_v59  ;;  %v849_v12 = vfloor.f32 %v753_v59 }
  0xff   : > { %v1477_v53 = vpop.f32.mrb[12].mxu1  ;;  %v1481_v60 = vpop.f32.mrb[13].mxu0  ;;  %v974_v0 = vmul.f32 0.03125, %v942_v49  ;;  %1029 = vst [vmem:[%s1439_s5 + $0x8] sm:$0xff] %v997_v50  ;;  %v931_v10 = vmin.f32 %v899_v1, 255.0  ;;  %v897_v11 = vmax.f32 %v865_v6, -256.0 }
 0x100   : > { %v1483_v61 = vpop.f32.mrb[13].mxu1  ;;  %v1486_v3 = vpop.f32.mrb[14].mxu0  ;;  %v947_v13 = vmin.f32 %v915_v5, 255.0  ;;  %v740_v14 = vmul.f32 32.0, %v1423_v55  ;;  %v881_v17 = vsel %vm785_vm13, %v817_v7, %v849_v12  ;;  %v756_v31 = vmul.f32 32.0, %v1425_v56 }
 0x101   : > { %v1488_v4 = vpop.f32.mrb[14].mxu1  ;;  %v1492_v51 = vpop.f32.mrb[15].mxu0  ;;  %v1013_v9 = vadd.f32 %v1430_v57, %v974_v0  ;;  %v963_v15 = vmul.f32 0.03125, %v931_v10  ;;  %v929_v16 = vmin.f32 %v897_v11, 255.0  ;;  %v913_v21 = vmax.f32 %v881_v17, -256.0 }
 0x102   : > { %v1494_v8 = vpop.f32.mrb[15].mxu1  ;;  %v979_v20 = vmul.f32 0.03125, %v947_v13  ;;  %vm772_vm14 = vcmp.lt.f32.partialorder %v740_v14, 0.0  ;;  %v804_v24 = vceil.f32 %v740_v14  ;;  %v836_v30 = vfloor.f32 %v740_v14 }
 0x103   : > { %1045 = vst [vmem:[%s1439_s5 + $0x88] sm:$0xff] %v1013_v9  ;;  %v1002_v25 = vadd.f32 %v1430_v57, %v963_v15  ;;  %v961_v26 = vmul.f32 0.03125, %v929_v16  ;;  %v945_v55 = vmin.f32 %v913_v21, 255.0  ;;  %v738_v34 = vmul.f32 32.0, %v1432_v62 }
 0x104   : > { %v1018_v32 = vadd.f32 %v1430_v57, %v979_v20  ;;  %v754_v35 = vmul.f32 32.0, %v1434_v63  ;;  %v868_v37 = vsel %vm772_vm14, %v804_v24, %v836_v30  ;;  %vm788_vm15 = vcmp.lt.f32.partialorder %v756_v31, 0.0 }
 0x105   : > { %1034 = vst [vmem:[%s1439_s5 + $0x30] sm:$0xff] %v1002_v25  ;;  %v1000_v36 = vadd.f32 %v1430_v57, %v961_v26  ;;  %v820_v38 = vceil.f32 %v756_v31  ;;  %v977_v39 = vmul.f32 0.03125, %v945_v55  ;;  %v900_v40 = vmax.f32 %v868_v37, -256.0 }
 0x106   : > { %1050 = vst [vmem:[%s1439_s5 + $0xb0] sm:$0xff] %v1018_v32  ;;  %v852_v41 = vfloor.f32 %v756_v31  ;;  %vm770_vm0 = vcmp.lt.f32.partialorder %v738_v34, 0.0  ;;  %v802_v56 = vceil.f32 %v738_v34  ;;  %v834_v42 = vfloor.f32 %v738_v34 }
 0x107   : > { %1032 = vst [vmem:[%s1439_s5 + $0x20] sm:$0xff] %v1000_v36  ;;  %vm786_vm1 = vcmp.lt.f32.partialorder %v754_v35, 0.0  ;;  %v818_v43 = vceil.f32 %v754_v35  ;;  %v1016_v62 = vadd.f32 %v1430_v57, %v977_v39  ;;  %v932_v63 = vmin.f32 %v900_v40, 255.0 }
 0x108   : > { %v884_v46 = vsel %vm788_vm15, %v820_v38, %v852_v41  ;;  %v850_v47 = vfloor.f32 %v754_v35  ;;  %v866_v49 = vsel %vm770_vm0, %v802_v56, %v834_v42  ;;  %v743_v59 = vmul.f32 32.0, %v1446_v18 }
 0x109   : > { %v916_v48 = vmax.f32 %v884_v46, -256.0  ;;  %1048 = vst [vmem:[%s1439_s5 + $0xa0] sm:$0xff] %v1016_v62  ;;  %v964_v52 = vmul.f32 0.03125, %v932_v63  ;;  %v898_v44 = vmax.f32 %v866_v49, -256.0  ;;  %v759_v0 = vmul.f32 32.0, %v1448_v19 }
 0x10a   : > { %v882_v50 = vsel %vm786_vm1, %v818_v43, %v850_v47  ;;  %v741_v5 = vmul.f32 32.0, %v1453_v22  ;;  %vm775_vm2 = vcmp.lt.f32.partialorder %v743_v59, 0.0  ;;  %v807_v9 = vceil.f32 %v743_v59 }
 0x10b   : > { %v948_v54 = vmin.f32 %v916_v48, 255.0  ;;  %v914_v58 = vmax.f32 %v882_v50, -256.0  ;;  %v1003_v1 = vadd.f32 %v1430_v57, %v964_v52  ;;  %v930_v2 = vmin.f32 %v898_v44, 255.0 }
 0x10c   : > { %v839_v11 = vfloor.f32 %v743_v59  ;;  %vm791_vm3 = vcmp.lt.f32.partialorder %v759_v0, 0.0  ;;  %v823_v12 = vceil.f32 %v759_v0  ;;  %v855_v13 = vfloor.f32 %v759_v0 }
 0x10d   : > { %v980_v6 = vmul.f32 0.03125, %v948_v54  ;;  %v946_v7 = vmin.f32 %v914_v58, 255.0  ;;  %1035 = vst [vmem:[%s1439_s5 + $0x38] sm:$0xff] %v1003_v1  ;;  %v962_v10 = vmul.f32 0.03125, %v930_v2  ;;  %vm773_vm4 = vcmp.lt.f32.partialorder %v741_v5, 0.0 }
 0x10e   : > { %v871_v22 = vsel %vm775_vm2, %v807_v9, %v839_v11  ;;  %v805_v15 = vceil.f32 %v741_v5  ;;  %v837_v16 = vfloor.f32 %v741_v5  ;;  %v887_v21 = vsel %vm791_vm3, %v823_v12, %v855_v13 }
 0x10f   : > { %v1019_v18 = vadd.f32 %v1430_v57, %v980_v6  ;;  %v978_v19 = vmul.f32 0.03125, %v946_v7  ;;  %v1001_v14 = vadd.f32 %v1430_v57, %v962_v10  ;;  %v903_v20 = vmax.f32 %v871_v22, -256.0 }
 0x110   : > { %v757_v24 = vmul.f32 32.0, %v1455_v23  ;;  %v919_v25 = vmax.f32 %v887_v21, -256.0  ;;  %v869_v26 = vsel %vm773_vm4, %v805_v15, %v837_v16  ;;  %v744_v35 = vmul.f32 32.0, %v1459_v27 }
 0x111   : > { %1051 = vst [vmem:[%s1439_s5 + $0xb8] sm:$0xff] %v1019_v18  ;;  %v1017_v17 = vadd.f32 %v1430_v57, %v978_v19  ;;  %1033 = vst [vmem:[%s1439_s5 + $0x28] sm:$0xff] %v1001_v14  ;;  %v935_v30 = vmin.f32 %v903_v20, 255.0  ;;  %v901_v31 = vmax.f32 %v869_v26, -256.0  ;;  %v760_v36 = vmul.f32 32.0, %v1461_v28 }
 0x112   : > { %vm789_vm5 = vcmp.lt.f32.partialorder %v757_v24, 0.0  ;;  %v821_v32 = vceil.f32 %v757_v24  ;;  %v951_v55 = vmin.f32 %v919_v25, 255.0  ;;  %v853_v34 = vfloor.f32 %v757_v24 }
 0x113   : > { %1049 = vst [vmem:[%s1439_s5 + $0xa8] sm:$0xff] %v1017_v17  ;;  %v967_v37 = vmul.f32 0.03125, %v935_v30  ;;  %v933_v38 = vmin.f32 %v901_v31, 255.0  ;;  %vm776_vm6 = vcmp.lt.f32.partialorder %v744_v35, 0.0  ;;  %v808_v23 = vceil.f32 %v744_v35 }
 0x114   : > { %v983_v39 = vmul.f32 0.03125, %v951_v55  ;;  %v885_v40 = vsel %vm789_vm5, %v821_v32, %v853_v34  ;;  %v840_v43 = vfloor.f32 %v744_v35  ;;  %vm792_vm7 = vcmp.lt.f32.partialorder %v760_v36, 0.0 }
 0x115   : > { %v1006_v41 = vadd.f32 %v1430_v57, %v967_v37  ;;  %v965_v56 = vmul.f32 0.03125, %v933_v38  ;;  %v917_v42 = vmax.f32 %v885_v40, -256.0  ;;  %v824_v27 = vceil.f32 %v760_v36 }
 0x116   : > { %v1022_v62 = vadd.f32 %v1430_v57, %v983_v39  ;;  %v856_v63 = vfloor.f32 %v760_v36  ;;  %v872_v47 = vsel %vm776_vm6, %v808_v23, %v840_v43  ;;  %v742_v48 = vmul.f32 32.0, %v1464_v29 }
 0x117   : > { %1038 = vst [vmem:[%s1439_s5 + $0x50] sm:$0xff] %v1006_v41  ;;  %v1004_v28 = vadd.f32 %v1430_v57, %v965_v56  ;;  %v949_v46 = vmin.f32 %v917_v42, 255.0  ;;  %v904_v49 = vmax.f32 %v872_v47, -256.0  ;;  %v758_v44 = vmul.f32 32.0, %v1466_v33 }
 0x118   : > { %1054 = vst [vmem:[%s1439_s5 + $0xd0] sm:$0xff] %v1022_v62  ;;  %v888_v52 = vsel %vm792_vm7, %v824_v27, %v856_v63  ;;  %vm774_vm8 = vcmp.lt.f32.partialorder %v742_v48, 0.0  ;;  %v806_v58 = vceil.f32 %v742_v48  ;;  %v838_v0 = vfloor.f32 %v742_v48 }
 0x119   : > { %1036 = vst [vmem:[%s1439_s5 + $0x40] sm:$0xff] %v1004_v28  ;;  %v981_v50 = vmul.f32 0.03125, %v949_v46  ;;  %v920_v54 = vmax.f32 %v888_v52, -256.0  ;;  %v936_v59 = vmin.f32 %v904_v49, 255.0  ;;  %vm790_vm9 = vcmp.lt.f32.partialorder %v758_v44, 0.0 }
 0x11a   : > { %v822_v1 = vceil.f32 %v758_v44  ;;  %v854_v6 = vfloor.f32 %v758_v44  ;;  %v747_v29 = vmul.f32 32.0, %v1475_v45  ;;  %v870_v9 = vsel %vm774_vm8, %v806_v58, %v838_v0 }
 0x11b   : > { %v1020_v2 = vadd.f32 %v1430_v57, %v981_v50  ;;  %v952_v5 = vmin.f32 %v920_v54, 255.0  ;;  %v968_v7 = vmul.f32 0.03125, %v936_v59  ;;  %v902_v10 = vmax.f32 %v870_v9, -256.0 }
 0x11c   : > { %v886_v11 = vsel %vm790_vm9, %v822_v1, %v854_v6  ;;  %vm779_vm10 = vcmp.lt.f32.partialorder %v747_v29, 0.0  ;;  %v811_v19 = vceil.f32 %v747_v29  ;;  %v843_v13 = vfloor.f32 %v747_v29 }
 0x11d   : > { %1052 = vst [vmem:[%s1439_s5 + $0xc0] sm:$0xff] %v1020_v2  ;;  %v984_v33 = vmul.f32 0.03125, %v952_v5  ;;  %v1007_v12 = vadd.f32 %v1430_v57, %v968_v7  ;;  %v918_v18 = vmax.f32 %v886_v11, -256.0  ;;  %v934_v22 = vmin.f32 %v902_v10, 255.0 }
 0x11e   : > { %v763_v15 = vmul.f32 32.0, %v1477_v53  ;;  %v745_v45 = vmul.f32 32.0, %v1481_v60  ;;  %v875_v17 = vsel %vm779_vm10, %v811_v19, %v843_v13  ;;  %v761_v60 = vmul.f32 32.0, %v1483_v61 }
 0x11f   : > { %v1023_v14 = vadd.f32 %v1430_v57, %v984_v33  ;;  %1039 = vst [vmem:[%s1439_s5 + $0x58] sm:$0xff] %v1007_v12  ;;  %v950_v16 = vmin.f32 %v918_v18, 255.0  ;;  %v966_v20 = vmul.f32 0.03125, %v934_v22  ;;  %v907_v21 = vmax.f32 %v875_v17, -256.0 }
 0x120   : > { %vm795_vm11 = vcmp.lt.f32.partialorder %v763_v15, 0.0  ;;  %v827_v24 = vceil.f32 %v763_v15  ;;  %v859_v26 = vfloor.f32 %v763_v15  ;;  %vm777_vm12 = vcmp.lt.f32.partialorder %v745_v45, 0.0 }
 0x121   : > { %1055 = vst [vmem:[%s1439_s5 + $0xd8] sm:$0xff] %v1023_v14  ;;  %v982_v25 = vmul.f32 0.03125, %v950_v16  ;;  %v809_v30 = vceil.f32 %v745_v45  ;;  %v1005_v31 = vadd.f32 %v1430_v57, %v966_v20  ;;  %v939_v32 = vmin.f32 %v907_v21, 255.0 }
 0x122   : > { %v841_v53 = vfloor.f32 %v745_v45  ;;  %v891_v34 = vsel %vm795_vm11, %v827_v24, %v859_v26  ;;  %v748_v35 = vmul.f32 32.0, %v1486_v3  ;;  %vm793_vm13 = vcmp.lt.f32.partialorder %v761_v60, 0.0 }
 0x123   : > { %v1021_v55 = vadd.f32 %v1430_v57, %v982_v25  ;;  %1037 = vst [vmem:[%s1439_s5 + $0x48] sm:$0xff] %v1005_v31  ;;  %v971_v36 = vmul.f32 0.03125, %v939_v32  ;;  %v923_v37 = vmax.f32 %v891_v34, -256.0  ;;  %v825_v40 = vceil.f32 %v761_v60 }
 0x124   : > { %v873_v38 = vsel %vm777_vm12, %v809_v30, %v841_v53  ;;  %v857_v23 = vfloor.f32 %v761_v60  ;;  %vm780_vm14 = vcmp.lt.f32.partialorder %v748_v35, 0.0  ;;  %v812_v61 = vceil.f32 %v748_v35 }
 0x125   : > { %1053 = vst [vmem:[%s1439_s5 + $0xc8] sm:$0xff] %v1021_v55  ;;  %v905_v39 = vmax.f32 %v873_v38, -256.0  ;;  %v1010_v41 = vadd.f32 %v1430_v57, %v971_v36  ;;  %v955_v56 = vmin.f32 %v923_v37, 255.0  ;;  %v844_v42 = vfloor.f32 %v748_v35 }
 0x126   : > { %v889_v62 = vsel %vm793_vm13, %v825_v40, %v857_v23  ;;  %v764_v3 = vmul.f32 32.0, %v1488_v4  ;;  %v746_v50 = vmul.f32 32.0, %v1492_v51  ;;  %v762_v4 = vmul.f32 32.0, %v1494_v8 }
 0x127   : > { %v937_v43 = vmin.f32 %v905_v39, 255.0  ;;  %1042 = vst [vmem:[%s1439_s5 + $0x70] sm:$0xff] %v1010_v41  ;;  %v987_v27 = vmul.f32 0.03125, %v955_v56  ;;  %v921_v63 = vmax.f32 %v889_v62, -256.0  ;;  %v876_v28 = vsel %vm780_vm14, %v812_v61, %v844_v42 }
 0x128   : > { %v908_v47 = vmax.f32 %v876_v28, -256.0  ;;  %vm796_vm15 = vcmp.lt.f32.partialorder %v764_v3, 0.0  ;;  %v828_v48 = vceil.f32 %v764_v3  ;;  %v860_v44 = vfloor.f32 %v764_v3 }
 0x129   : > { %v969_v46 = vmul.f32 0.03125, %v937_v43  ;;  %v1026_v49 = vadd.f32 %v1430_v57, %v987_v27  ;;  %v953_v52 = vmin.f32 %v921_v63, 255.0  ;;  %vm778_vm0 = vcmp.lt.f32.partialorder %v746_v50, 0.0 }
 0x12a   : > { %v940_v58 = vmin.f32 %v908_v47, 255.0  ;;  %v892_v0 = vsel %vm796_vm15, %v828_v48, %v860_v44  ;;  %v810_v1 = vceil.f32 %v746_v50  ;;  %v842_v6 = vfloor.f32 %v746_v50 }
 0x12b   : > { %v1008_v54 = vadd.f32 %v1430_v57, %v969_v46  ;;  %1058 = vst [vmem:[%s1439_s5 + $0xf0] sm:$0xff] %v1026_v49  ;;  %v985_v59 = vmul.f32 0.03125, %v953_v52  ;;  %v924_v5 = vmax.f32 %v892_v0, -256.0  ;;  %vm794_vm1 = vcmp.lt.f32.partialorder %v762_v4, 0.0 }
 0x12c   : > { %v972_v2 = vmul.f32 0.03125, %v940_v58  ;;  %v826_v51 = vceil.f32 %v762_v4  ;;  %v858_v7 = vfloor.f32 %v762_v4  ;;  %v874_v33 = vsel %vm778_vm0, %v810_v1, %v842_v6 }
 0x12d   : > { %1040 = vst [vmem:[%s1439_s5 + $0x60] sm:$0xff] %v1008_v54  ;;  %v1024_v29 = vadd.f32 %v1430_v57, %v985_v59  ;;  %v956_v8 = vmin.f32 %v924_v5, 255.0  ;;  %v906_v10 = vmax.f32 %v874_v33, -256.0 }
 0x12e   : > { %v1011_v9 = vadd.f32 %v1430_v57, %v972_v2  ;;  %v890_v11 = vsel %vm794_vm1, %v826_v51, %v858_v7 }
 0x12f   : > { %1056 = vst [vmem:[%s1439_s5 + $0xe0] sm:$0xff] %v1024_v29  ;;  %v988_v12 = vmul.f32 0.03125, %v956_v8  ;;  %v922_v18 = vmax.f32 %v890_v11, -256.0  ;;  %v938_v19 = vmin.f32 %v906_v10, 255.0 }
 0x130   : > { %1043 = vst [vmem:[%s1439_s5 + $0x78] sm:$0xff] %v1011_v9 }
 0x131   : > { %v1027_v13 = vadd.f32 %v1430_v57, %v988_v12  ;;  %v954_v14 = vmin.f32 %v922_v18, 255.0  ;;  %v970_v22 = vmul.f32 0.03125, %v938_v19 }
 0x133   : > { %1059 = vst [vmem:[%s1439_s5 + $0xf8] sm:$0xff] %v1027_v13  ;;  %v986_v15 = vmul.f32 0.03125, %v954_v14  ;;  %v1009_v45 = vadd.f32 %v1430_v57, %v970_v22 }
 0x135   : > { %v1025_v16 = vadd.f32 %v1430_v57, %v986_v15  ;;  %1041 = vst [vmem:[%s1439_s5 + $0x68] sm:$0xff] %v1009_v45 }
 0x137   : > { %1057 = vst [vmem:[%s1439_s5 + $0xe8] sm:$0xff] %v1025_v16 }
 0x138 PF: > { %s13_s14 = sadd.s32 1, %s1322_s14   ;;  %s1579_s12 = smov %s1318_s13 }
 0x139   : > { %p10_p5 = scmp.ge.s32.totalorder %s13_s14, 4   ;;  %s1580_s13 = smov %s1582_s15 }
 0x13b   :  { %12 = sbr.rel (!%p10_p5) target bundleno = 2 (0x2), region = 73 }

</bundles_post_ra>
